<compile_context>
chip_gen: v7x
topology: tpu7x:2x2x1
jax: 0.10.0
libtpu: 0.0.40
codegen_flags: <defaults>
</compile_context>

<pallas_src>
import jax
import jax.numpy as jnp
from jax.experimental import pallas as pl
from jax.experimental.pallas import tpu as pltpu


def _round_up(n, m):
    return ((n + m - 1) // m) * m


def _vmem_capacity_bytes():
    try:
        return int(pltpu.get_tpu_info().vmem_capacity_bytes)
    except Exception:
        return 64 * 1024 * 1024  # conservative: v7x per-TensorCore VMEM


def _mlp_kernel(x_ref, w1_ref, b1_ref, w2_ref, b2_ref, w3_ref, b3_ref, o_ref):
    # fc1 + ReLU  (MXU matmul, f32 accumulation; bias add + ReLU on VPU in f32)
    h1 = jnp.dot(x_ref[...], w1_ref[...], preferred_element_type=jnp.float32)
    h1 = jnp.maximum(h1 + b1_ref[...], 0.0)
    # fc2 + ReLU  (hidden width padded 124 -> 128: lane-dense, no masked ops)
    h2 = jnp.dot(h1.astype(w2_ref.dtype), w2_ref[...],
                 preferred_element_type=jnp.float32)
    h2 = jnp.maximum(h2 + b2_ref[...], 0.0)
    # fc3 (no activation; padded output columns stay all-zero by construction)
    h3 = jnp.dot(h2.astype(w3_ref.dtype), w3_ref[...],
                 preferred_element_type=jnp.float32)
    o_ref[...] = (h3 + b3_ref[...]).astype(o_ref.dtype)


def prepare_params(w1, b1, w2, b2, w3, b3, compute_dtype=jnp.float32):
    """One-time parameter conversion: lane-align narrow dims, cast MXU operands.

    Weights are stored (in_features, out_features), i.e. y = x @ W + b matches
    PyTorch's x @ W_pt.T + b.  Biases stay f32 (epilogue math is f32 on all
    chip generations).  Returns (prepared_params, out_dim).
    """
    h2_dim = w2.shape[1]              # 124 (logical)
    out_dim = w3.shape[1]
    h2_pad = _round_up(h2_dim, 128)
    out_pad = _round_up(out_dim, 128)

    w2p = jnp.pad(w2, ((0, 0), (0, h2_pad - h2_dim)))
    b2p = jnp.pad(b2.reshape(1, -1), ((0, 0), (0, h2_pad - h2_dim)))
    w3p = jnp.pad(w3, ((0, h2_pad - h2_dim), (0, out_pad - out_dim)))
    b3p = jnp.pad(b3.reshape(1, -1), ((0, 0), (0, out_pad - out_dim)))

    prepared = (
        w1.astype(compute_dtype),
        b1.reshape(1, -1).astype(jnp.float32),
        w2p.astype(compute_dtype),
        b2p.astype(jnp.float32),
        w3p.astype(compute_dtype),
        b3p.astype(jnp.float32),
    )
    return prepared, out_dim


def fully_connected_block(x, prepared_params, out_dim):
    """Fused 3-layer MLP forward as one batch-tiled Pallas kernel."""
    w1, b1, w2, b2, w3, b3 = prepared_params
    batch, input_dim = x.shape
    h1_dim = w1.shape[1]              # 512
    h2_pad = w2.shape[1]              # 128
    out_pad = w3.shape[1]             # multiple of 128
    compute_dtype = w1.dtype
    xc = x if x.dtype == compute_dtype else x.astype(compute_dtype)
    elt = jnp.dtype(compute_dtype).itemsize

    # --- batch tiling: large tiles amortize the ~0.35us/step overhead -------
    tb = min(512, _round_up(batch, 8))
    if tb > batch and batch < 8:
        tb = batch                    # full-extent block for tiny batches
    if batch > 16 and pl.cdiv(batch, tb) < 2:
        # keep >= 2 grid steps so both v7x TensorCores get work
        tb = max(8, _round_up(pl.cdiv(batch, 2), 8))

    # --- VMEM budget from hardware (v7x: 64 MiB/TC) --------------------------
    vmem_budget = int(0.80 * _vmem_capacity_bytes())
    weight_bytes = (elt * (input_dim * h1_dim + h1_dim * h2_pad
                           + h2_pad * out_pad)            # single-buffered
                    + 4 * (h1_dim + h2_pad + out_pad))    # f32 biases
    row_bytes = (2 * input_dim * elt      # x tile (double-buffered)
                 + 2 * out_pad * 4        # out tile (double-buffered, f32)
                 + (h1_dim + h2_pad) * 4)  # f32 activations
    while tb > 8 and weight_bytes + tb * row_bytes > vmem_budget:
        tb = max(8, _round_up(tb // 2, 8))

    grid = (pl.cdiv(batch, tb),)          # ragged last block: stores masked
    vmem_limit = int(min(vmem_budget,
                         max(32 * 1024 * 1024,
                             weight_bytes + tb * row_bytes + (4 << 20))))

    cost = pl.CostEstimate(
        flops=int(2 * batch * (input_dim * h1_dim + h1_dim * h2_pad
                               + h2_pad * out_pad)),
        transcendentals=0,
        bytes_accessed=int(weight_bytes
                           + batch * (input_dim * elt + out_pad * 4)),
    )

    def _launch(single_buffer_weights):
        extra = {}
        if single_buffer_weights:
            # resident blocks: constant index_map, fetched once, 1 buffer
            extra = dict(pipeline_mode=pl.Buffered(1))
        grid_spec = pltpu.PrefetchScalarGridSpec(
            num_scalar_prefetch=0,
            grid=grid,
            in_specs=[
                pl.BlockSpec((tb, input_dim), lambda i: (i, 0)),          # x
                pl.BlockSpec((input_dim, h1_dim), lambda i: (0, 0), **extra),
                pl.BlockSpec((1, h1_dim), lambda i: (0, 0), **extra),
                pl.BlockSpec((h1_dim, h2_pad), lambda i: (0, 0), **extra),
                pl.BlockSpec((1, h2_pad), lambda i: (0, 0), **extra),
                pl.BlockSpec((h2_pad, out_pad), lambda i: (0, 0), **extra),
                pl.BlockSpec((1, out_pad), lambda i: (0, 0), **extra),
            ],
            out_specs=pl.BlockSpec((tb, out_pad), lambda i: (i, 0)),
        )
        return pl.pallas_call(
            _mlp_kernel,
            out_shape=jax.ShapeDtypeStruct((batch, out_pad), jnp.float32),
            grid_spec=grid_spec,
            compiler_params=pltpu.CompilerParams(
                dimension_semantics=("parallel",),
                vmem_limit_bytes=vmem_limit,
            ),
            cost_estimate=cost,
        )(xc, w1, b1, w2, b2, w3, b3)

    try:
        out_padded = _launch(True)
    except Exception:
        # Fallback if this JAX build rejects single-buffered resident blocks.
        out_padded = _launch(False)

    # TODO(synk): for tiny out_dim at very large batch, emit a bf16 output and
    # cast back in the wrapper to halve the padded-output HBM write traffic.
    return out_padded[:, :out_dim]


def init_params(key, input_dim, output_dim):
    """Deterministic synthetic parameters (PyTorch Linear shapes, transposed)."""
    ks = jax.random.split(key, 6)
    w1 = jax.random.normal(ks[0], (input_dim, 512), jnp.float32) * 0.02
    b1 = jax.random.normal(ks[1], (512,), jnp.float32) * 0.01
    w2 = jax.random.normal(ks[2], (512, 124), jnp.float32) * 0.02
    b2 = jax.random.normal(ks[3], (124,), jnp.float32) * 0.01
    w3 = jax.random.normal(ks[4], (124, output_dim), jnp.float32) * 0.02
    b3 = jax.random.normal(ks[5], (output_dim,), jnp.float32) * 0.01
    return w1, b1, w2, b2, w3, b3


def reference_forward(x, w1, b1, w2, b2, w3, b3):
    h1 = jnp.maximum(x @ w1 + b1, 0.0)
    h2 = jnp.maximum(h1 @ w2 + b2, 0.0)
    return h2 @ w3 + b3


if __name__ == "__main__":
    key = jax.random.PRNGKey(0)
    k_x, k_p = jax.random.split(key)

    batch = 2
    input_dim = 64
    output_dim = 10

    x = jax.random.normal(k_x, (batch, input_dim), jnp.float32)
    raw_params = init_params(k_p, input_dim, output_dim)
    ref = reference_forward(x, *raw_params)

    # f32 operand path: exact parity with the f32 PyTorch reference.
    prepared_f32, out_dim = prepare_params(*raw_params,
                                           compute_dtype=jnp.float32)
    out_f32 = jax.block_until_ready(
        fully_connected_block(x, prepared_f32, out_dim))
    assert out_f32.shape == (batch, output_dim)
    assert jnp.allclose(out_f32, ref, atol=1e-4, rtol=1e-4)

    # bf16 operand path (f32 MXU accumulation): ~2x MXU throughput / half DMA.
    prepared_bf16, _ = prepare_params(*raw_params,
                                      compute_dtype=jnp.bfloat16)
    out_bf16 = jax.block_until_ready(
        fully_connected_block(x, prepared_bf16, out_dim))
    assert out_bf16.shape == (batch, output_dim)
    assert jnp.allclose(out_bf16, ref, atol=1e-2, rtol=5e-2)

    print("KERNEL_OK")
</pallas_src>

<mosaic_0001>
module attributes {stable_mosaic.version = 11 : i64} {
  func.func @_mlp_kernel(%arg0: i32, %arg1: memref<2x64xf32, #tpu.memory_space<vmem>>, %arg2: memref<64x512xf32, #tpu.memory_space<vmem>>, %arg3: memref<1x512xf32, #tpu.memory_space<vmem>>, %arg4: memref<512x128xf32, #tpu.memory_space<vmem>>, %arg5: memref<1x128xf32, #tpu.memory_space<vmem>>, %arg6: memref<128x128xf32, #tpu.memory_space<vmem>>, %arg7: memref<1x128xf32, #tpu.memory_space<vmem>>, %arg8: memref<2x128xf32, #tpu.memory_space<vmem>>) attributes {dimension_semantics = [#tpu.dimension_semantics<parallel>], iteration_bounds = array<i64: 1>, scalar_prefetch = 0 : i64, scratch_operands = 0 : i64, tpu.core_type = #tpu.core_type<tc>, window_params = [{transform_indices = @transform_0, window_bounds = array<i64: 2, 64>}, {pipeline_mode = #tpu.pipeline_mode<synchronous>, transform_indices = @transform_1, window_bounds = array<i64: 64, 512>}, {pipeline_mode = #tpu.pipeline_mode<synchronous>, transform_indices = @transform_2, window_bounds = array<i64: 1, 512>}, {pipeline_mode = #tpu.pipeline_mode<synchronous>, transform_indices = @transform_3, window_bounds = array<i64: 512, 128>}, {pipeline_mode = #tpu.pipeline_mode<synchronous>, transform_indices = @transform_4, window_bounds = array<i64: 1, 128>}, {pipeline_mode = #tpu.pipeline_mode<synchronous>, transform_indices = @transform_5, window_bounds = array<i64: 128, 128>}, {pipeline_mode = #tpu.pipeline_mode<synchronous>, transform_indices = @transform_6, window_bounds = array<i64: 1, 128>}, {transform_indices = @transform_7, window_bounds = array<i64: 2, 128>}]} {
    %c0 = arith.constant 0 : index
    %c0_0 = arith.constant 0 : index
    %0 = vector.load %arg1[%c0, %c0_0] : memref<2x64xf32, #tpu.memory_space<vmem>>, vector<2x64xf32>
    %c0_1 = arith.constant 0 : index
    %c0_2 = arith.constant 0 : index
    %1 = vector.load %arg2[%c0_1, %c0_2] : memref<64x512xf32, #tpu.memory_space<vmem>>, vector<64x512xf32>
    %cst = arith.constant dense<0.000000e+00> : vector<2x512xf32>
    %2 = tpu.matmul %0, %1, %cst {dimension_numbers = #tpu.dot_dimension_numbers<[1], [0], [0], [1], [0, 0, 1, 1], [], []>} : vector<2x64xf32>, vector<64x512xf32>, vector<2x512xf32> -> vector<2x512xf32>
    %c0_3 = arith.constant 0 : index
    %c0_4 = arith.constant 0 : index
    %3 = vector.load %arg3[%c0_3, %c0_4] : memref<1x512xf32, #tpu.memory_space<vmem>>, vector<1x512xf32>
    %4 = vector.broadcast %3 : vector<1x512xf32> to vector<2x512xf32>
    %5 = arith.addf %2, %4 : vector<2x512xf32>
    %cst_5 = arith.constant 0.000000e+00 : f32
    %6 = vector.broadcast %cst_5 : f32 to vector<2x512xf32>
    %7 = arith.maximumf %5, %6 : vector<2x512xf32>
    %c0_6 = arith.constant 0 : index
    %c0_7 = arith.constant 0 : index
    %8 = vector.load %arg4[%c0_6, %c0_7] : memref<512x128xf32, #tpu.memory_space<vmem>>, vector<512x128xf32>
    %cst_8 = arith.constant dense<0.000000e+00> : vector<2x128xf32>
    %9 = tpu.matmul %7, %8, %cst_8 {dimension_numbers = #tpu.dot_dimension_numbers<[1], [0], [0], [1], [0, 0, 1, 1], [], []>} : vector<2x512xf32>, vector<512x128xf32>, vector<2x128xf32> -> vector<2x128xf32>
    %c0_9 = arith.constant 0 : index
    %c0_10 = arith.constant 0 : index
    %10 = vector.load %arg5[%c0_9, %c0_10] : memref<1x128xf32, #tpu.memory_space<vmem>>, vector<1x128xf32>
    %11 = vector.broadcast %10 : vector<1x128xf32> to vector<2x128xf32>
    %12 = arith.addf %9, %11 : vector<2x128xf32>
    %cst_11 = arith.constant 0.000000e+00 : f32
    %13 = vector.broadcast %cst_11 : f32 to vector<2x128xf32>
    %14 = arith.maximumf %12, %13 : vector<2x128xf32>
    %c0_12 = arith.constant 0 : index
    %c0_13 = arith.constant 0 : index
    %15 = vector.load %arg6[%c0_12, %c0_13] : memref<128x128xf32, #tpu.memory_space<vmem>>, vector<128x128xf32>
    %cst_14 = arith.constant dense<0.000000e+00> : vector<2x128xf32>
    %16 = tpu.matmul %14, %15, %cst_14 {dimension_numbers = #tpu.dot_dimension_numbers<[1], [0], [0], [1], [0, 0, 1, 1], [], []>} : vector<2x128xf32>, vector<128x128xf32>, vector<2x128xf32> -> vector<2x128xf32>
    %c0_15 = arith.constant 0 : index
    %c0_16 = arith.constant 0 : index
    %17 = vector.load %arg7[%c0_15, %c0_16] : memref<1x128xf32, #tpu.memory_space<vmem>>, vector<1x128xf32>
    %18 = vector.broadcast %17 : vector<1x128xf32> to vector<2x128xf32>
    %19 = arith.addf %16, %18 : vector<2x128xf32>
    %c0_17 = arith.constant 0 : index
    %c0_18 = arith.constant 0 : index
    %20 = vector.load %arg8[%c0_17, %c0_18] : memref<2x128xf32, #tpu.memory_space<vmem>>, vector<2x128xf32>
    tpu.vector_store %arg8[%c0_17, %c0_18], %19 {strides = array<i32>} : memref<2x128xf32, #tpu.memory_space<vmem>>, vector<2x128xf32>,
    return
  }
  func.func @transform_0(%arg0: i32) -> (i32, i32) {
    %c0_i32 = arith.constant 0 : i32
    %c0_i32_0 = arith.constant 0 : i32
    return %arg0, %c0_i32 : i32, i32
  }
  func.func @transform_1(%arg0: i32) -> (i32, i32) {
    %c0_i32 = arith.constant 0 : i32
    %c0_i32_0 = arith.constant 0 : i32
    %c0_i32_1 = arith.constant 0 : i32
    return %c0_i32, %c0_i32_0 : i32, i32
  }
  func.func @transform_2(%arg0: i32) -> (i32, i32) {
    %c0_i32 = arith.constant 0 : i32
    %c0_i32_0 = arith.constant 0 : i32
    %c0_i32_1 = arith.constant 0 : i32
    return %c0_i32, %c0_i32_0 : i32, i32
  }
  func.func @transform_3(%arg0: i32) -> (i32, i32) {
    %c0_i32 = arith.constant 0 : i32
    %c0_i32_0 = arith.constant 0 : i32
    %c0_i32_1 = arith.constant 0 : i32
    return %c0_i32, %c0_i32_0 : i32, i32
  }
  func.func @transform_4(%arg0: i32) -> (i32, i32) {
    %c0_i32 = arith.constant 0 : i32
    %c0_i32_0 = arith.constant 0 : i32
    %c0_i32_1 = arith.constant 0 : i32
    return %c0_i32, %c0_i32_0 : i32, i32
  }
  func.func @transform_5(%arg0: i32) -> (i32, i32) {
    %c0_i32 = arith.constant 0 : i32
    %c0_i32_0 = arith.constant 0 : i32
    %c0_i32_1 = arith.constant 0 : i32
    return %c0_i32, %c0_i32_0 : i32, i32
  }
  func.func @transform_6(%arg0: i32) -> (i32, i32) {
    %c0_i32 = arith.constant 0 : i32
    %c0_i32_0 = arith.constant 0 : i32
    %c0_i32_1 = arith.constant 0 : i32
    return %c0_i32, %c0_i32_0 : i32, i32
  }
  func.func @transform_7(%arg0: i32) -> (i32, i32) {
    %c0_i32 = arith.constant 0 : i32
    %c0_i32_0 = arith.constant 0 : i32
    return %arg0, %c0_i32 : i32, i32
  }
}

module attributes {stable_mosaic.version = 11 : i64} {
  func.func @_mlp_kernel(%arg0: i32, %arg1: memref<2x64xf32, #tpu.memory_space<vmem>>, %arg2: memref<64x512xf32, #tpu.memory_space<vmem>>, %arg3: memref<1x512xf32, #tpu.memory_space<vmem>>, %arg4: memref<512x128xf32, #tpu.memory_space<vmem>>, %arg5: memref<1x128xf32, #tpu.memory_space<vmem>>, %arg6: memref<128x128xf32, #tpu.memory_space<vmem>>, %arg7: memref<1x128xf32, #tpu.memory_space<vmem>>, %arg8: memref<2x128xf32, #tpu.memory_space<vmem>>) attributes {dimension_semantics = [#tpu.dimension_semantics<parallel>], iteration_bounds = array<i64: 1>, scalar_prefetch = 0 : i64, scratch_operands = 0 : i64, tpu.core_type = #tpu.core_type<tc>, window_params = [{transform_indices = @transform_0, window_bounds = array<i64: 2, 64>}, {pipeline_mode = #tpu.pipeline_mode<synchronous>, transform_indices = @transform_1, window_bounds = array<i64: 64, 512>}, {pipeline_mode = #tpu.pipeline_mode<synchronous>, transform_indices = @transform_2, window_bounds = array<i64: 1, 512>}, {pipeline_mode = #tpu.pipeline_mode<synchronous>, transform_indices = @transform_3, window_bounds = array<i64: 512, 128>}, {pipeline_mode = #tpu.pipeline_mode<synchronous>, transform_indices = @transform_4, window_bounds = array<i64: 1, 128>}, {pipeline_mode = #tpu.pipeline_mode<synchronous>, transform_indices = @transform_5, window_bounds = array<i64: 128, 128>}, {pipeline_mode = #tpu.pipeline_mode<synchronous>, transform_indices = @transform_6, window_bounds = array<i64: 1, 128>}, {transform_indices = @transform_7, window_bounds = array<i64: 2, 128>}]} {
    %c0 = arith.constant 0 : index
    %c0_0 = arith.constant 0 : index
    %0 = vector.load %arg1[%c0, %c0_0] : memref<2x64xf32, #tpu.memory_space<vmem>>, vector<2x64xf32>
    %c0_1 = arith.constant 0 : index
    %c0_2 = arith.constant 0 : index
    %1 = vector.load %arg2[%c0_1, %c0_2] : memref<64x512xf32, #tpu.memory_space<vmem>>, vector<64x512xf32>
    %cst = arith.constant dense<0.000000e+00> : vector<2x512xf32>
    %2 = tpu.matmul %0, %1, %cst {dimension_numbers = #tpu.dot_dimension_numbers<[1], [0], [0], [1], [0, 0, 1, 1], [], []>} : vector<2x64xf32>, vector<64x512xf32>, vector<2x512xf32> -> vector<2x512xf32>
    %c0_3 = arith.constant 0 : index
    %c0_4 = arith.constant 0 : index
    %3 = vector.load %arg3[%c0_3, %c0_4] : memref<1x512xf32, #tpu.memory_space<vmem>>, vector<1x512xf32>
    %4 = vector.broadcast %3 : vector<1x512xf32> to vector<2x512xf32>
    %5 = arith.addf %2, %4 : vector<2x512xf32>
    %cst_5 = arith.constant 0.000000e+00 : f32
    %6 = vector.broadcast %cst_5 : f32 to vector<2x512xf32>
    %7 = arith.maximumf %5, %6 : vector<2x512xf32>
    %c0_6 = arith.constant 0 : index
    %c0_7 = arith.constant 0 : index
    %8 = vector.load %arg4[%c0_6, %c0_7] : memref<512x128xf32, #tpu.memory_space<vmem>>, vector<512x128xf32>
    %cst_8 = arith.constant dense<0.000000e+00> : vector<2x128xf32>
    %9 = tpu.matmul %7, %8, %cst_8 {dimension_numbers = #tpu.dot_dimension_numbers<[1], [0], [0], [1], [0, 0, 1, 1], [], []>} : vector<2x512xf32>, vector<512x128xf32>, vector<2x128xf32> -> vector<2x128xf32>
    %c0_9 = arith.constant 0 : index
    %c0_10 = arith.constant 0 : index
    %10 = vector.load %arg5[%c0_9, %c0_10] : memref<1x128xf32, #tpu.memory_space<vmem>>, vector<1x128xf32>
    %11 = vector.broadcast %10 : vector<1x128xf32> to vector<2x128xf32>
    %12 = arith.addf %9, %11 : vector<2x128xf32>
    %cst_11 = arith.constant 0.000000e+00 : f32
    %13 = vector.broadcast %cst_11 : f32 to vector<2x128xf32>
    %14 = arith.maximumf %12, %13 : vector<2x128xf32>
    %c0_12 = arith.constant 0 : index
    %c0_13 = arith.constant 0 : index
    %15 = vector.load %arg6[%c0_12, %c0_13] : memref<128x128xf32, #tpu.memory_space<vmem>>, vector<128x128xf32>
    %cst_14 = arith.constant dense<0.000000e+00> : vector<2x128xf32>
    %16 = tpu.matmul %14, %15, %cst_14 {dimension_numbers = #tpu.dot_dimension_numbers<[1], [0], [0], [1], [0, 0, 1, 1], [], []>} : vector<2x128xf32>, vector<128x128xf32>, vector<2x128xf32> -> vector<2x128xf32>
    %c0_15 = arith.constant 0 : index
    %c0_16 = arith.constant 0 : index
    %17 = vector.load %arg7[%c0_15, %c0_16] : memref<1x128xf32, #tpu.memory_space<vmem>>, vector<1x128xf32>
    %18 = vector.broadcast %17 : vector<1x128xf32> to vector<2x128xf32>
    %19 = arith.addf %16, %18 : vector<2x128xf32>
    %c0_17 = arith.constant 0 : index
    %c0_18 = arith.constant 0 : index
    %20 = vector.load %arg8[%c0_17, %c0_18] : memref<2x128xf32, #tpu.memory_space<vmem>>, vector<2x128xf32>
    tpu.vector_store %arg8[%c0_17, %c0_18], %19 {strides = array<i32>} : memref<2x128xf32, #tpu.memory_space<vmem>>, vector<2x128xf32>,
    return
  }
  func.func @transform_0(%arg0: i32) -> (i32, i32) {
    %c0_i32 = arith.constant 0 : i32
    %c0_i32_0 = arith.constant 0 : i32
    return %arg0, %c0_i32 : i32, i32
  }
  func.func @transform_1(%arg0: i32) -> (i32, i32) {
    %c0_i32 = arith.constant 0 : i32
    %c0_i32_0 = arith.constant 0 : i32
    %c0_i32_1 = arith.constant 0 : i32
    return %c0_i32, %c0_i32_0 : i32, i32
  }
  func.func @transform_2(%arg0: i32) -> (i32, i32) {
    %c0_i32 = arith.constant 0 : i32
    %c0_i32_0 = arith.constant 0 : i32
    %c0_i32_1 = arith.constant 0 : i32
    return %c0_i32, %c0_i32_0 : i32, i32
  }
  func.func @transform_3(%arg0: i32) -> (i32, i32) {
    %c0_i32 = arith.constant 0 : i32
    %c0_i32_0 = arith.constant 0 : i32
    %c0_i32_1 = arith.constant 0 : i32
    return %c0_i32, %c0_i32_0 : i32, i32
  }
  func.func @transform_4(%arg0: i32) -> (i32, i32) {
    %c0_i32 = arith.constant 0 : i32
    %c0_i32_0 = arith.constant 0 : i32
    %c0_i32_1 = arith.constant 0 : i32
    return %c0_i32, %c0_i32_0 : i32, i32
  }
  func.func @transform_5(%arg0: i32) -> (i32, i32) {
    %c0_i32 = arith.constant 0 : i32
    %c0_i32_0 = arith.constant 0 : i32
    %c0_i32_1 = arith.constant 0 : i32
    return %c0_i32, %c0_i32_0 : i32, i32
  }
  func.func @transform_6(%arg0: i32) -> (i32, i32) {
    %c0_i32 = arith.constant 0 : i32
    %c0_i32_0 = arith.constant 0 : i32
    %c0_i32_1 = arith.constant 0 : i32
    return %c0_i32, %c0_i32_0 : i32, i32
  }
  func.func @transform_7(%arg0: i32) -> (i32, i32) {
    %c0_i32 = arith.constant 0 : i32
    %c0_i32_0 = arith.constant 0 : i32
    return %arg0, %c0_i32 : i32, i32
  }
}

</mosaic_0001>

<bundles_post_ra>
// kernel: tpu_custom_call.1
= control target key start
LH: loop header
LB: loop body
LE: loop exit
PB: predicated region body
PF: predicated region fallthrough
CT: control target
= control target key end

     0   :  { %12 = vsyncpa [#allocation3], 0  ;;  %s1114_s0 = inlined_call_operand.hbm [shape: f32[2,64], index: 0, kind: input, shape index: {}]   ;;  %s1115_s1 = inlined_call_operand.hbm [shape: f32[64,512], index: 1, kind: input, shape index: {}]   ;;  %s1116_s2 = inlined_call_operand.vmem [shape: f32[1,512], index: 2, kind: input, shape index: {}]   ;;  %s1117_s3 = inlined_call_operand.hbm [shape: f32[512,128], index: 3, kind: input, shape index: {}]   ;;  %s1118_s4 = inlined_call_operand.vmem [shape: f32[1,128], index: 4, kind: input, shape index: {}]   ;;  %s1119_s5 = inlined_call_operand.hbm [shape: f32[128,128], index: 5, kind: input, shape index: {}]   ;;  %s1120_s6 = inlined_call_operand.vmem [shape: f32[1,128], index: 6, kind: input, shape index: {}]   ;;  %s1121_s7 = inlined_call_operand.hbm [shape: f32[2,128], index: 7, kind: output, shape index: {}]  }
   0x1   :  { %13 = vsyncpa [#allocation6], 0 }
   0x2   :  { %14 = vsyncpa [#allocation9], 0 }
   0x3   :  { %15 = vsyncpa [#allocation4], 0  ;;  %s984_s24 = smov [#allocation5]   ;;  %s866_s28 = scalar_lea.hbm %s1115_s1, 4096 }
   0x4   :  { %s31_s25 = sshll.u32 %s984_s24, 4  ;;  %p867_p0 = scmp.ne.s32.totalorder %s1115_s1, %s866_s28  ;;  %s32_s25 = int_to_ptr.vmem [resolvable:$true] %s31_s25 }
   0x5   :  { %p870_p1 = scmp.lt.u32.totalorder %s866_s28, %s1115_s1 }
   0x7   :  { %p872_p2 = pnand %p870_p1, %p867_p0 }
   0x9   :  { %875 = shalt.err (!%p872_p2)
}
   0xa   :  { %s876_s10 = scalar_lea.vmem %s32_s25, 4096  ;;  %p881_p4 = scmp.lt.s32.totalorder %s32_s25, %s32_s25 }
   0xb   :  { %p877_p3 = scmp.ne.s32.totalorder %s32_s25, %s876_s10  ;;  %p882_p5 = scmp.lt.s32.totalorder %s876_s10, %s876_s10 }
   0xd   :  { %p883_p6 = por %p882_p5, %p881_p4 }
   0xf   :  { %p884_p7 = pnand %p883_p6, %p877_p3 }
  0x11   :  { %887 = shalt.err (!%p884_p7)
}
  0x12   :  { %s985_s11 = smov 512   ;;  %s986_s12 = smov 32  }
  0x13   :  { %37 = dma.hbm_to_vmem [thread:$0]  %s1115_s1, 4096, %s32_s25, [#allocation6], %s985_s11, %s985_s11, %s986_s12  }
  0x14   :  { %s987_s15 = smov [#allocation2]   ;;  %s988_s17 = smov [#allocation7]  }
  0x15   :  { %s22_s16 = sshll.u32 %s987_s15, 4  ;;  %s45_s18 = sshll.u32 %s988_s17, 4  ;;  %s23_s16 = int_to_ptr.vmem [resolvable:$true] %s22_s16  ;;  %s46_s18 = int_to_ptr.vmem [resolvable:$true] %s45_s18 }
  0x16   :  { %s888_s21 = scalar_lea.hbm %s1114_s0, 32 }
  0x17   :  { %p889_p8 = scmp.ne.s32.totalorder %s1114_s0, %s888_s21  ;;  %p892_p9 = scmp.lt.u32.totalorder %s888_s21, %s1114_s0 }
  0x19   :  { %p894_p10 = pnand %p892_p9, %p889_p8 }
  0x1b   :  { %897 = shalt.err (!%p894_p10)
}
  0x1c   :  { %s898_s1 = scalar_lea.vmem %s23_s16, 32  ;;  %p903_p12 = scmp.lt.s32.totalorder %s23_s16, %s23_s16 }
  0x1d   :  { %p899_p11 = scmp.ne.s32.totalorder %s23_s16, %s898_s1  ;;  %p904_p13 = scmp.lt.s32.totalorder %s898_s1, %s898_s1 }
  0x1f   :  { %p905_p0 = por %p904_p13, %p903_p12 }
  0x21   :  { %p906_p1 = pnand %p905_p0, %p899_p11 }
  0x23   :  { %909 = shalt.err (!%p906_p1)
}
  0x24   :  { %25 = dma.hbm_to_vmem [thread:$0]  %s1114_s0, 32, %s23_s16, [#allocation3]  }
  0x25   :  { %s910_s30 = scalar_lea.hbm %s1117_s3, 8192 }
  0x26   :  { %p911_p2 = scmp.ne.s32.totalorder %s1117_s3, %s910_s30  ;;  %p914_p3 = scmp.lt.u32.totalorder %s910_s30, %s1117_s3 }
  0x28   :  { %p916_p4 = pnand %p914_p3, %p911_p2 }
  0x2a   :  { %919 = shalt.err (!%p916_p4)
}
  0x2b   :  { %s920_s12 = scalar_lea.vmem %s46_s18, 8192  ;;  %p925_p6 = scmp.lt.s32.totalorder %s46_s18, %s46_s18 }
  0x2c   :  { %p921_p5 = scmp.ne.s32.totalorder %s46_s18, %s920_s12  ;;  %p926_p7 = scmp.lt.s32.totalorder %s920_s12, %s920_s12 }
  0x2e   :  { %p927_p8 = por %p926_p7, %p925_p6 }
  0x30   :  { %p928_p9 = pnand %p927_p8, %p921_p5 }
  0x32   :  { %931 = shalt.err (!%p928_p9)
}
  0x33   :  { %s989_s0 = smov 128   ;;  %s990_s13 = smov 8  }
  0x34   :  { %51 = dma.hbm_to_vmem [thread:$0]  %s1117_s3, 8192, %s46_s18, [#allocation6], %s989_s0, %s989_s0, %s990_s13  }
  0x35   :  { %s991_s16 = smov [#allocation8]   ;;  %s932_s21 = scalar_lea.hbm %s1119_s5, 2048 }
  0x36   :  { %s59_s17 = sshll.u32 %s991_s16, 4  ;;  %p933_p10 = scmp.ne.s32.totalorder %s1119_s5, %s932_s21  ;;  %s60_s17 = int_to_ptr.vmem [resolvable:$true] %s59_s17 }
  0x37   :  { %p936_p11 = scmp.lt.u32.totalorder %s932_s21, %s1119_s5 }
  0x39   :  { %p938_p12 = pnand %p936_p11, %p933_p10 }
  0x3b   :  { %941 = shalt.err (!%p938_p12)
}
  0x3c   :  { %s942_s1 = scalar_lea.vmem %s60_s17, 2048  ;;  %p947_p0 = scmp.lt.s32.totalorder %s60_s17, %s60_s17 }
  0x3d   :  { %p943_p13 = scmp.ne.s32.totalorder %s60_s17, %s942_s1  ;;  %p948_p1 = scmp.lt.s32.totalorder %s942_s1, %s942_s1 }
  0x3f   :  { %p949_p2 = por %p948_p1, %p947_p0 }
  0x41   :  { %p950_p3 = pnand %p949_p2, %p943_p13 }
  0x43   :  { %953 = shalt.err (!%p950_p3)
}
  0x44   :  { %65 = dma.hbm_to_vmem [thread:$0]  %s1119_s5, 2048, %s60_s17, [#allocation9], %s989_s0, %s989_s0, %s990_s13  }
  0x45   :  { %976 = dma.done.wait [#allocation3], 32  }
  0x46   :  { %977 = vsyncadd [#allocation3], 4294967264 }
  0x47   :  { %978 = dma.done.wait [#allocation6], 12288  }
  0x48   :  { %979 = vsyncadd [#allocation6], 4294955008 }
  0x49   :  { %980 = dma.done.wait [#allocation9], 2048  }
  0x4a   :  { %981 = vsyncadd [#allocation9], 4294965248  ;;  %v992_v0 = vmov 0.0   ;;  %v82_v1 = vld [vmem:[#allocation5 + $0x8] sm:$0xff]  ;;  %v81_v3 = vld [vmem:[#allocation5] sm:$0xff]  ;;  %vm135_vm0 = vcmask 523264  }
  0x4b   :  { %203 = vmatprep.mubr.f32.mxu1 %v992_v0  ;;  %v86_v2 = vld [vmem:[#allocation5 + $0x28] sm:$0xff]  ;;  %v85_v5 = vld [vmem:[#allocation5 + $0x20] sm:$0xff]  ;;  %v84_v24 = vld [vmem:[#allocation5 + $0x18] sm:$0xff]  ;;  %vm994_vm1 = vmmov 0   ;;  %s995_s30 = smov [#allocation10]  }
  0x4c   :  { %v734_v4 = vpack.c.bf16 %v86_v2, %v82_v1  ;;  %v90_v6 = vld [vmem:[#allocation5 + $0x48] sm:$0xff]  ;;  %v736_v8 = vpack.c.bf16 %v85_v5, %v81_v3  ;;  %v89_v10 = vld [vmem:[#allocation5 + $0x40] sm:$0xff]  ;;  %v88_v25 = vld [vmem:[#allocation5 + $0x38] sm:$0xff]  ;;  %s597_s8 = sshll.u32 %s995_s30, 4  ;;  %s598_s8 = int_to_ptr.vmem [resolvable:$true] %s597_s8 }
  0x4d   :  { %v94_v7 = vld [vmem:[#allocation5 + $0x68] sm:$0xff]  ;;  %v93_v11 = vld [vmem:[#allocation5 + $0x60] sm:$0xff]  ;;  %v83_v26 = vld [vmem:[#allocation5 + $0x10] sm:$0xff]  ;;  %v750_v36 = vpack.c.bf16 %v88_v25, %v84_v24  ;;  %s954_s9 = scalar_lea.vmem %s598_s8, 32  ;;  %p959_p5 = scmp.lt.s32.totalorder %s598_s8, %s598_s8 }
  0x4e   :  { %v738_v9 = vpack.c.bf16 %v94_v7, %v90_v6  ;;  %v98_v12 = vld [vmem:[#allocation5 + $0x88] sm:$0xff]  ;;  %735 = vmatprep.subr.bf16.mxu1 %v734_v4  ;;  %v740_v14 = vpack.c.bf16 %v93_v11, %v89_v10  ;;  %v97_v16 = vld [vmem:[#allocation5 + $0x80] sm:$0xff]  ;;  %v87_v27 = vld [vmem:[#allocation5 + $0x30] sm:$0xff]  ;;  %p955_p4 = scmp.ne.s32.totalorder %s598_s8, %s954_s9  ;;  %p960_p6 = scmp.lt.s32.totalorder %s954_s9, %s954_s9 }
  0x4f   :  { %v102_v13 = vld [vmem:[#allocation5 + $0xa8] sm:$0xff]  ;;  %737 = vmatpush1.bf16.msra.mxu1 %v736_v8  ;;  %v101_v17 = vld [vmem:[#allocation5 + $0xa0] sm:$0xff]  ;;  %v303_v34 = vld [vmem:[#allocation7 + $0x90] sm:$0xff]  ;;  %v752_v47 = vpack.c.bf16 %v87_v27, %v83_v26 }
  0x50   :  { %739 = vmatprep.subr.bf16.mxu1 %v738_v9  ;;  %v742_v15 = vpack.c.bf16 %v102_v13, %v98_v12  ;;  %v106_v18 = vld [vmem:[#allocation5 + $0xc8] sm:$0xff]  ;;  %v744_v20 = vpack.c.bf16 %v101_v17, %v97_v16  ;;  %v105_v22 = vld [vmem:[#allocation5 + $0xc0] sm:$0xff]  ;;  %v304_v35 = vld [vmem:[#allocation7 + $0x98] sm:$0xff]  ;;  %p961_p7 = por %p960_p6, %p959_p5 }
  0x51   :  { %v110_v19 = vld [vmem:[#allocation5 + $0xe8] sm:$0xff]  ;;  %v109_v23 = vld [vmem:[#allocation5 + $0xe0] sm:$0xff]  ;;  %v92_v37 = vld [vmem:[#allocation5 + $0x58] sm:$0xff]  ;;  %v770_v39 = vpack.c.bf16 %v304_v35, %v303_v34 }
  0x52   :  { %v746_v21 = vpack.c.bf16 %v110_v19, %v106_v18  ;;  %v301_v28 = vld [vmem:[#allocation7 + $0x80] sm:$0xff]  ;;  %v302_v29 = vld [vmem:[#allocation7 + $0x88] sm:$0xff]  ;;  %v748_v31 = vpack.c.bf16 %v109_v23, %v105_v22  ;;  %v287_v40 = vld [vmem:[#allocation7 + $0x10] sm:$0xff]  ;;  %p962_p8 = pnand %p961_p7, %p955_p4 }
  0x53   :  { %741 = vmatpush1.bf16.msra.mxu1 %v740_v14  ;;  %v285_v30 = vld [vmem:[#allocation7] sm:$0xff]  ;;  %v766_v32 = vpack.c.bf16 %v302_v29, %v301_v28  ;;  %v286_v33 = vld [vmem:[#allocation7 + $0x8] sm:$0xff]  ;;  %v288_v41 = vld [vmem:[#allocation7 + $0x18] sm:$0xff] }
  0x54   :  { %743 = vmatprep.subr.bf16.mxu1 %v742_v15  ;;  %v768_v38 = vpack.c.bf16 %v286_v33, %v285_v30  ;;  %v96_v42 = vld [vmem:[#allocation5 + $0x78] sm:$0xff]  ;;  %v305_v43 = vld [vmem:[#allocation7 + $0xa0] sm:$0xff]  ;;  %v306_v44 = vld [vmem:[#allocation7 + $0xa8] sm:$0xff]  ;;  %v772_v46 = vpack.c.bf16 %v288_v41, %v287_v40 }
  0x55   :  { %767 = vmatprep.subr.bf16.mxu0 %v766_v32  ;;  %v1085_v45 = vld [vmem:[#allocation2] sm:$0x3]  ;;  %v91_v48 = vld [vmem:[#allocation5 + $0x50] sm:$0xff]  ;;  %v289_v49 = vld [vmem:[#allocation7 + $0x20] sm:$0xff]  ;;  %v754_v51 = vpack.c.bf16 %v96_v42, %v92_v37  ;;  %v774_v53 = vpack.c.bf16 %v306_v44, %v305_v43 }
  0x56   :  { %769 = vmatpush3.bf16.msra.mxu0 %v768_v38  ;;  %v290_v50 = vld [vmem:[#allocation7 + $0x28] sm:$0xff]  ;;  %v95_v52 = vld [vmem:[#allocation5 + $0x70] sm:$0xff]  ;;  %v308_v55 = vld [vmem:[#allocation7 + $0xb8] sm:$0xff] }
  0x57   :  { %745 = vmatpush1.bf16.msra.mxu1 %v744_v20  ;;  %771 = vmatprep.subr.bf16.mxu0 %v770_v39  ;;  %v307_v54 = vld [vmem:[#allocation7 + $0xb0] sm:$0xff]  ;;  %v100_v56 = vld [vmem:[#allocation5 + $0x98] sm:$0xff]  ;;  %v776_v58 = vpack.c.bf16 %v290_v50, %v289_v49  ;;  %v756_v59 = vpack.c.bf16 %v95_v52, %v91_v48  ;;  %v309_v3 = vld [vmem:[#allocation7 + $0xc0] sm:$0xff] }
  0x58   :  { %747 = vmatprep.subr.bf16.mxu1 %v746_v21  ;;  %v104_v57 = vld [vmem:[#allocation5 + $0xb8] sm:$0xff]  ;;  %v99_v60 = vld [vmem:[#allocation5 + $0x90] sm:$0xff]  ;;  %v778_v61 = vpack.c.bf16 %v308_v55, %v307_v54  ;;  %v310_v4 = vld [vmem:[#allocation7 + $0xc8] sm:$0xff] }
  0x59   :  { %v291_v62 = vld [vmem:[#allocation7 + $0x30] sm:$0xff]  ;;  %v292_v63 = vld [vmem:[#allocation7 + $0x38] sm:$0xff]  ;;  %v758_v1 = vpack.c.bf16 %v104_v57, %v100_v56  ;;  %v782_v10 = vpack.c.bf16 %v310_v4, %v309_v3  ;;  %v293_v11 = vld [vmem:[#allocation7 + $0x40] sm:$0xff] }
  0x5a   :  { %773 = vmatpush3.bf16.msra.mxu0 %v772_v46  ;;  %v103_v2 = vld [vmem:[#allocation5 + $0xb0] sm:$0xff]  ;;  %v108_v5 = vld [vmem:[#allocation5 + $0xd8] sm:$0xff]  ;;  %v780_v7 = vpack.c.bf16 %v292_v63, %v291_v62  ;;  %v294_v12 = vld [vmem:[#allocation7 + $0x48] sm:$0xff] }
  0x5b   :  { %749 = vmatpush1.bf16.msra.mxu1 %v748_v31  ;;  %775 = vmatprep.subr.bf16.mxu0 %v774_v53  ;;  %v112_v6 = vld [vmem:[#allocation5 + $0xf8] sm:$0xff]  ;;  %v760_v8 = vpack.c.bf16 %v103_v2, %v99_v60  ;;  %v107_v9 = vld [vmem:[#allocation5 + $0xd0] sm:$0xff]  ;;  %v333_v17 = vld [vmem:[#allocation7 + $0x180] sm:$0xff]  ;;  %v784_v19 = vpack.c.bf16 %v294_v12, %v293_v11 }
  0x5c   :  { %751 = vmatprep.subr.bf16.mxu1 %v750_v36  ;;  %v762_v13 = vpack.c.bf16 %v112_v6, %v108_v5  ;;  %v111_v14 = vld [vmem:[#allocation5 + $0xf0] sm:$0xff]  ;;  %v312_v16 = vld [vmem:[#allocation7 + $0xd8] sm:$0xff]  ;;  %v334_v18 = vld [vmem:[#allocation7 + $0x188] sm:$0xff] }
  0x5d   :  { %v311_v15 = vld [vmem:[#allocation7 + $0xd0] sm:$0xff]  ;;  %v764_v20 = vpack.c.bf16 %v111_v14, %v107_v9  ;;  %v317_v21 = vld [vmem:[#allocation7 + $0x100] sm:$0xff]  ;;  %v296_v24 = vld [vmem:[#allocation7 + $0x58] sm:$0xff]  ;;  %v798_v25 = vpack.c.bf16 %v334_v18, %v333_v17 }
  0x5e   :  { %608 = vmatmul.mubr.msk.f32.vlgmr.msra.gmra.mrb[0].mxu1 %vm135_vm0, %v1085_v45  ;;  %777 = vmatpush3.bf16.msra.mxu0 %v776_v58  ;;  %v786_v22 = vpack.c.bf16 %v312_v16, %v311_v15  ;;  %v295_v23 = vld [vmem:[#allocation7 + $0x50] sm:$0xff]  ;;  %v318_v26 = vld [vmem:[#allocation7 + $0x108] sm:$0xff]  ;;  %v313_v27 = vld [vmem:[#allocation7 + $0xe0] sm:$0xff] }
  0x5f   :  { %753 = vmatpush1.bf16.msra.mxu1 %v752_v47  ;;  %274 = vmatprep.mubr.f32.mxu1 %v992_v0  ;;  %v314_v28 = vld [vmem:[#allocation7 + $0xe8] sm:$0xff]  ;;  %v335_v29 = vld [vmem:[#allocation7 + $0x190] sm:$0xff]  ;;  %v336_v30 = vld [vmem:[#allocation7 + $0x198] sm:$0xff]  ;;  %v788_v31 = vpack.c.bf16 %v296_v24, %v295_v23  ;;  %v800_v32 = vpack.c.bf16 %v318_v26, %v317_v21  ;;  %v115_v21 = vlaneseq }
  0x60   :  { %755 = vmatprep.subr.bf16.mxu1 %v754_v51  ;;  %779 = vmatprep.subr.bf16.mxu0 %v778_v61  ;;  %v790_v33 = vpack.c.bf16 %v314_v28, %v313_v27  ;;  %v802_v34 = vpack.c.bf16 %v336_v30, %v335_v29  ;;  %v319_v35 = vld [vmem:[#allocation7 + $0x110] sm:$0xff]  ;;  %v320_v36 = vld [vmem:[#allocation7 + $0x118] sm:$0xff]  ;;  %v337_v37 = vld [vmem:[#allocation7 + $0x1a0] sm:$0xff] }
  0x61   :  { %v338_v38 = vld [vmem:[#allocation7 + $0x1a8] sm:$0xff]  ;;  %v804_v39 = vpack.c.bf16 %v320_v36, %v319_v35  ;;  %v297_v41 = vld [vmem:[#allocation7 + $0x60] sm:$0xff]  ;;  %v315_v48 = vld [vmem:[#allocation7 + $0xf0] sm:$0xff] }
  0x62   :  { %781 = vmatpush3.bf16.msra.mxu0 %v780_v7  ;;  %v806_v40 = vpack.c.bf16 %v338_v38, %v337_v37  ;;  %v298_v42 = vld [vmem:[#allocation7 + $0x68] sm:$0xff]  ;;  %v321_v43 = vld [vmem:[#allocation7 + $0x120] sm:$0xff]  ;;  %v316_v49 = vld [vmem:[#allocation7 + $0xf8] sm:$0xff] }
  0x63   :  { %757 = vmatpush1.bf16.msra.mxu1 %v756_v59  ;;  %783 = vmatprep.subr.bf16.mxu0 %v782_v10  ;;  %v792_v44 = vpack.c.bf16 %v298_v42, %v297_v41  ;;  %v322_v46 = vld [vmem:[#allocation7 + $0x128] sm:$0xff]  ;;  %v339_v50 = vld [vmem:[#allocation7 + $0x1b0] sm:$0xff]  ;;  %v340_v51 = vld [vmem:[#allocation7 + $0x1b8] sm:$0xff] }
  0x64   :  { %759 = vmatprep.subr.bf16.mxu1 %v758_v1  ;;  %v808_v47 = vpack.c.bf16 %v322_v46, %v321_v43  ;;  %v299_v52 = vld [vmem:[#allocation7 + $0x70] sm:$0xff]  ;;  %v300_v53 = vld [vmem:[#allocation7 + $0x78] sm:$0xff]  ;;  %v810_v54 = vpack.c.bf16 %v340_v51, %v339_v50  ;;  %v341_v59 = vld [vmem:[#allocation7 + $0x1c0] sm:$0xff] }
  0x65   :  { %v796_v55 = vpack.c.bf16 %v300_v53, %v299_v52  ;;  %v323_v56 = vld [vmem:[#allocation7 + $0x130] sm:$0xff]  ;;  %v324_v57 = vld [vmem:[#allocation7 + $0x138] sm:$0xff]  ;;  %v342_v60 = vld [vmem:[#allocation7 + $0x1c8] sm:$0xff] }
  0x66   :  { %785 = vmatpush3.bf16.msra.mxu0 %v784_v19  ;;  %v812_v58 = vpack.c.bf16 %v324_v57, %v323_v56  ;;  %v814_v61 = vpack.c.bf16 %v342_v60, %v341_v59  ;;  %v325_v62 = vld [vmem:[#allocation7 + $0x140] sm:$0xff]  ;;  %v326_v63 = vld [vmem:[#allocation7 + $0x148] sm:$0xff]  ;;  %v343_v2 = vld [vmem:[#allocation7 + $0x1d0] sm:$0xff] }
  0x67   :  { %761 = vmatpush1.bf16.msra.mxu1 %v760_v8  ;;  %787 = vmatprep.subr.bf16.mxu0 %v786_v22  ;;  %v816_v1 = vpack.c.bf16 %v326_v63, %v325_v62  ;;  %v344_v3 = vld [vmem:[#allocation7 + $0x1d8] sm:$0xff]  ;;  %v327_v4 = vld [vmem:[#allocation7 + $0x150] sm:$0xff]  ;;  %v345_v7 = vld [vmem:[#allocation7 + $0x1e0] sm:$0xff]  ;;  %v116_v22 = vshrl.u32 %v115_v21, 7 }
  0x68   :  { %763 = vmatprep.subr.bf16.mxu1 %v762_v13  ;;  %v818_v5 = vpack.c.bf16 %v344_v3, %v343_v2  ;;  %v328_v6 = vld [vmem:[#allocation7 + $0x158] sm:$0xff]  ;;  %v346_v8 = vld [vmem:[#allocation7 + $0x1e8] sm:$0xff]  ;;  %v329_v11 = vld [vmem:[#allocation7 + $0x160] sm:$0xff] }
  0x69   :  { %v820_v9 = vpack.c.bf16 %v328_v6, %v327_v4  ;;  %v822_v10 = vpack.c.bf16 %v346_v8, %v345_v7  ;;  %v330_v12 = vld [vmem:[#allocation7 + $0x168] sm:$0xff]  ;;  %v347_v14 = vld [vmem:[#allocation7 + $0x1f0] sm:$0xff]  ;;  %v348_v15 = vld [vmem:[#allocation7 + $0x1f8] sm:$0xff]  ;;  %v117_v23 = vsub.s32 0, %v116_v22  ;;  %v129_v41 = vsub.s32 3, %v116_v22 }
  0x6a   :  { %789 = vmatpush3.bf16.msra.mxu0 %v788_v31  ;;  %v824_v13 = vpack.c.bf16 %v330_v12, %v329_v11  ;;  %v826_v16 = vpack.c.bf16 %v348_v15, %v347_v14  ;;  %v331_v17 = vld [vmem:[#allocation7 + $0x170] sm:$0xff]  ;;  %v332_v18 = vld [vmem:[#allocation7 + $0x178] sm:$0xff]  ;;  %v497_v31 = vld [vmem:[#allocation8] sm:$0xff] }
  0x6b   :  { %765 = vmatpush1.bf16.msra.mxu1 %v764_v20  ;;  %791 = vmatprep.subr.bf16.mxu0 %v790_v33  ;;  %v828_v19 = vpack.c.bf16 %v332_v18, %v331_v17  ;;  %v993_v20 = vmov 0.0|0.0   ;;  %v113_v24 = vld [vmem:[%s1116_s2] sm:$0xf]  ;;  %v502_v51 = vld [vmem:[#allocation8 + $0x28] sm:$0xff]  ;;  %v505_v56 = vld [vmem:[#allocation8 + $0x40] sm:$0xff] }
  0x6c   :  { %799 = vmatprep.subr.bf16.mxu1 %v798_v25  ;;  %v121_v25 = vsub.s32 1, %v116_v22  ;;  %v118_v26 = vrot.slane %v113_v24, %v117_v23  ;;  %v499_v37 = vld [vmem:[#allocation8 + $0x10] sm:$0xff]  ;;  %v500_v38 = vld [vmem:[#allocation8 + $0x18] sm:$0xff]  ;;  %v130_v43 = vrot.slane %v113_v24, %v129_v41  ;;  %v506_v57 = vld [vmem:[#allocation8 + $0x48] sm:$0xff] }
  0x6d   :  { %v503_v53 = vld [vmem:[#allocation8 + $0x30] sm:$0xff]  ;;  %v508_v60 = vld [vmem:[#allocation8 + $0x58] sm:$0xff]  ;;  %v509_v62 = vld [vmem:[#allocation8 + $0x60] sm:$0xff] }
  0x6e   :  { %609 = vmatmul.mubr.msk.f32.vlgmr.msra.gmra.mrb[2].mxu1 %vm135_vm0, %v1085_v45  ;;  %793 = vmatpush3.bf16.msra.mxu0 %v792_v44  ;;  %v794_v45 = vpack.c.bf16 %v316_v49, %v315_v48  ;;  %v122_v27 = vrot.slane %v113_v24, %v121_v25  ;;  %v507_v59 = vld [vmem:[#allocation8 + $0x50] sm:$0xff]  ;;  %v510_v63 = vld [vmem:[#allocation8 + $0x68] sm:$0xff]  ;;  %v512_v3 = vld [vmem:[#allocation8 + $0x78] sm:$0xff] }
  0x6f   :  { %801 = vmatpush3.bf16.msra.mxu1 %v800_v32  ;;  %v498_v32 = vld [vmem:[#allocation8 + $0x8] sm:$0xff]  ;;  %v511_v2 = vld [vmem:[#allocation8 + $0x70] sm:$0xff] }
  0x70   :  { %803 = vmatprep.subr.bf16.mxu1 %v802_v34  ;;  %795 = vmatprep.subr.bf16.mxu0 %v794_v45  ;;  %v831_v36 = vpack.c.bf16 %v498_v32, %v497_v31  ;;  %v501_v45 = vld [vmem:[#allocation8 + $0x20] sm:$0xff]  ;;  %v852_v4 = vpack.c.bf16 %v512_v3, %v511_v2  ;;  %v610_v8 = vld [vmem:[%s1118_s4] ss:$0 sm:$0xff] }
  0x71   :  { %v837_v52 = vpack.c.bf16 %v502_v51, %v501_v45  ;;  %v611_v15 = vld [vmem:[%s1120_s6] ss:$0 sm:$0xff] }
  0x72   :  { %797 = vmatpush3.bf16.msra.mxu0 %v796_v55 }
  0x73   :  { %805 = vmatpush3.bf16.msra.mxu1 %v804_v39  ;;  %830 = vmatprep.subr.bf16.mxu0 %v993_v20  ;;  %v834_v39 = vpack.c.bf16 %v500_v38, %v499_v37 }
  0x74   :  { %807 = vmatprep.subr.bf16.mxu1 %v806_v40  ;;  %v125_v40 = vsub.s32 2, %v116_v22 }
  0x76   :  { %v126_v42 = vrot.slane %v113_v24, %v125_v40 }
  0x77   :  { %809 = vmatpush3.bf16.msra.mxu1 %v808_v47 }
  0x78   :  { %811 = vmatprep.subr.bf16.mxu1 %v810_v54  ;;  %v504_v54 = vld [vmem:[#allocation8 + $0x38] sm:$0xff] }
  0x79   :  { %v840_v55 = vpack.c.bf16 %v504_v54, %v503_v53 }
  0x7b   :  { %813 = vmatpush3.bf16.msra.mxu1 %v812_v58  ;;  %v843_v58 = vpack.c.bf16 %v506_v57, %v505_v56 }
  0x7c   :  { %815 = vmatprep.subr.bf16.mxu1 %v814_v61  ;;  %v846_v61 = vpack.c.bf16 %v508_v60, %v507_v59 }
  0x7f   :  { %817 = vmatpush3.bf16.msra.mxu1 %v816_v1  ;;  %v849_v1 = vpack.c.bf16 %v510_v63, %v509_v62 }
  0x80   :  { %819 = vmatprep.subr.bf16.mxu1 %v818_v5 }
  0x83   :  { %821 = vmatpush3.bf16.msra.mxu1 %v820_v9 }
  0x84   :  { %823 = vmatprep.subr.bf16.mxu1 %v822_v10 }
  0x87   :  { %825 = vmatpush3.bf16.msra.mxu1 %v824_v13 }
  0x88   :  { %827 = vmatprep.subr.bf16.mxu1 %v826_v16 }
  0x8b   :  { %829 = vmatpush3.bf16.msra.mxu1 %v828_v19 }
 0x131   :  { %v205_v28 = vpop.f32.mrb[0].mxu1 }
 0x132   :  { %v206_v29 = vadd.f32 %v205_v28, %v118_v26  ;;  %v207_v30 = vpop.f32.mrb[1].mxu1 }
 0x133   :  { %v208_v33 = vadd.f32 %v207_v30, %v122_v27 }
 0x134   :  { %v281_v34 = vmax.f32 %v206_v29, 0.0 }
 0x135   :  { %v282_v35 = vmax.f32 %v208_v33, 0.0 }
 0x137   :  { %420 = vmatprep.mubr.f32.mxu0 %v282_v35 }
 0x138   :  { %421 = vmatmul.mubr.f32.vlgmr.msra.gmra.mrb[0].mxu0 %v281_v34 }
 0x139   :  { %832 = vmatpush3.bf16.msra.mxu0 %v831_v36  ;;  %731 = vmatprep.mubr.msk.f32.mxu0 %vm994_vm1, %v992_v0 }
 0x13a   :  { %833 = vmatprep.subr.bf16.mxu0 %v993_v20 }
 0x13d   :  { %835 = vmatpush3.bf16.msra.mxu0 %v834_v39 }
 0x13e   :  { %836 = vmatprep.subr.bf16.mxu0 %v993_v20 }
 0x141   :  { %v276_v44 = vpop.f32.mrb[2].mxu1  ;;  %838 = vmatpush3.bf16.msra.mxu0 %v837_v52 }
 0x142   :  { %v277_v46 = vadd.f32 %v276_v44, %v126_v42  ;;  %v278_v47 = vpop.f32.mrb[3].mxu1  ;;  %839 = vmatprep.subr.bf16.mxu0 %v993_v20 }
 0x143   :  { %v279_v48 = vadd.f32 %v278_v47, %v130_v43 }
 0x144   :  { %v283_v50 = vmax.f32 %v277_v46, 0.0 }
 0x145   :  { %v284_v49 = vmax.f32 %v279_v48, 0.0  ;;  %841 = vmatpush3.bf16.msra.mxu0 %v840_v55 }
 0x146   :  { %842 = vmatprep.subr.bf16.mxu0 %v993_v20 }
 0x147   :  { %490 = vmatprep.mubr.f32.mxu1 %v284_v49 }
 0x148   :  { %491 = vmatmul.mubr.f32.vlgmr.msra.gmra.mrb[4].mxu1 %v283_v50 }
 0x149   :  { %844 = vmatpush3.bf16.msra.mxu0 %v843_v58 }
 0x14a   :  { %845 = vmatprep.subr.bf16.mxu0 %v993_v20 }
 0x14d   :  { %847 = vmatpush3.bf16.msra.mxu0 %v846_v61 }
 0x14e   :  { %848 = vmatprep.subr.bf16.mxu0 %v993_v20 }
 0x151   :  { %850 = vmatpush3.bf16.msra.mxu0 %v849_v1 }
 0x152   :  { %851 = vmatprep.subr.bf16.mxu0 %v993_v20 }
 0x155   :  { %853 = vmatpush3.bf16.msra.mxu0 %v852_v4 }
 0x20b   :  { %v644_v5 = vpop.f32.mrb[0].mxu0 }
 0x20c   :  { %v645_v6 = vpop.f32.mrb[1].mxu0 }
 0x20d   :  { %v646_v7 = vadd.f32 %v645_v6, %v644_v5 }
 0x20f   :  { %v423_v11 = vadd.f32 %v646_v7, %v610_v8 }
 0x21b   :  { %v679_v9 = vpop.f32.mrb[4].mxu1 }
 0x21c   :  { %v680_v10 = vpop.f32.mrb[5].mxu1 }
 0x21d   :  { %v681_v12 = vadd.f32 %v680_v10, %v679_v9 }
 0x21f   :  { %v493_v13 = vadd.f32 %v681_v12, %v423_v11 }
 0x221   :  { %v496_v14 = vmax.f32 %v493_v13, 0.0 }
 0x223   :  { %732 = vmatmul.mubr.f32.vlgmr.msra.gmra.mrb[2].mxu0 %v496_v14 }
 0x2f6   :  { %v586_v0 = vpop.f32.mrb[2].mxu0 }
 0x2f7   :  { %v587_v16 = vadd.f32 %v611_v15, %v586_v0  ;;  %v733_v17 = vpop.f32.mrb[3].mxu0 }
 0x2f9   :  { %590 = vst [vmem:[#allocation10] sm:$0x3] %v587_v16 }
 0x2fa   :  { %965 = shalt.err (!%p962_p8)
}
 0x2fb   :  { %s966_s11 = scalar_lea.hbm %s1121_s7, 32 }
 0x2fc   :  { %p967_p9 = scmp.ne.s32.totalorder %s1121_s7, %s966_s11  ;;  %p970_p10 = scmp.lt.u32.totalorder %s966_s11, %s1121_s7 }
 0x2fe   :  { %p972_p11 = pnand %p970_p10, %p967_p9 }
 0x300   :  { %975 = shalt.err (!%p972_p11)
}
 0x301   :  { %600 = dma.vmem_to_hbm [thread:$0]  %s598_s8, 32, %s1121_s7, [#allocation4]  }
 0x302   :  { %982 = dma.done.wait [#allocation4], 32  }
 0x303   :  { %983 = vsyncadd [#allocation4], 4294967264 }
 0x304   :  { %604 = vsyncpa [#allocation3], 1 }
 0x305   :  { %605 = vsyncpa [#allocation6], 1 }
 0x306   :  { %606 = vsyncpa [#allocation9], 1 }
 0x307   :  { %607 = vsyncpa [#allocation4], 1 }

// kernel: tpu_custom_call.1
= control target key start
LH: loop header
LB: loop body
LE: loop exit
PB: predicated region body
PF: predicated region fallthrough
CT: control target
= control target key end

     0   :  { %12 = vsyncpa [#allocation3], 0  ;;  %s1114_s0 = inlined_call_operand.hbm [shape: f32[2,64], index: 0, kind: input, shape index: {}]   ;;  %s1115_s1 = inlined_call_operand.hbm [shape: f32[64,512], index: 1, kind: input, shape index: {}]   ;;  %s1116_s2 = inlined_call_operand.vmem [shape: f32[1,512], index: 2, kind: input, shape index: {}]   ;;  %s1117_s3 = inlined_call_operand.hbm [shape: f32[512,128], index: 3, kind: input, shape index: {}]   ;;  %s1118_s4 = inlined_call_operand.vmem [shape: f32[1,128], index: 4, kind: input, shape index: {}]   ;;  %s1119_s5 = inlined_call_operand.hbm [shape: f32[128,128], index: 5, kind: input, shape index: {}]   ;;  %s1120_s6 = inlined_call_operand.vmem [shape: f32[1,128], index: 6, kind: input, shape index: {}]   ;;  %s1121_s7 = inlined_call_operand.hbm [shape: f32[2,128], index: 7, kind: output, shape index: {}]  }
   0x1   :  { %13 = vsyncpa [#allocation6], 0 }
   0x2   :  { %14 = vsyncpa [#allocation9], 0 }
   0x3   :  { %15 = vsyncpa [#allocation4], 0  ;;  %s984_s24 = smov [#allocation5]   ;;  %s866_s28 = scalar_lea.hbm %s1115_s1, 4096 }
   0x4   :  { %s31_s25 = sshll.u32 %s984_s24, 4  ;;  %p867_p0 = scmp.ne.s32.totalorder %s1115_s1, %s866_s28  ;;  %s32_s25 = int_to_ptr.vmem [resolvable:$true] %s31_s25 }
   0x5   :  { %p870_p1 = scmp.lt.u32.totalorder %s866_s28, %s1115_s1 }
   0x7   :  { %p872_p2 = pnand %p870_p1, %p867_p0 }
   0x9   :  { %875 = shalt.err (!%p872_p2)
}
   0xa   :  { %s876_s10 = scalar_lea.vmem %s32_s25, 4096  ;;  %p881_p4 = scmp.lt.s32.totalorder %s32_s25, %s32_s25 }
   0xb   :  { %p877_p3 = scmp.ne.s32.totalorder %s32_s25, %s876_s10  ;;  %p882_p5 = scmp.lt.s32.totalorder %s876_s10, %s876_s10 }
   0xd   :  { %p883_p6 = por %p882_p5, %p881_p4 }
   0xf   :  { %p884_p7 = pnand %p883_p6, %p877_p3 }
  0x11   :  { %887 = shalt.err (!%p884_p7)
}
  0x12   :  { %s985_s11 = smov 512   ;;  %s986_s12 = smov 32  }
  0x13   :  { %37 = dma.hbm_to_vmem [thread:$0]  %s1115_s1, 4096, %s32_s25, [#allocation6], %s985_s11, %s985_s11, %s986_s12  }
  0x14   :  { %s987_s15 = smov [#allocation2]   ;;  %s988_s17 = smov [#allocation7]  }
  0x15   :  { %s22_s16 = sshll.u32 %s987_s15, 4  ;;  %s45_s18 = sshll.u32 %s988_s17, 4  ;;  %s23_s16 = int_to_ptr.vmem [resolvable:$true] %s22_s16  ;;  %s46_s18 = int_to_ptr.vmem [resolvable:$true] %s45_s18 }
  0x16   :  { %s888_s21 = scalar_lea.hbm %s1114_s0, 32 }
  0x17   :  { %p889_p8 = scmp.ne.s32.totalorder %s1114_s0, %s888_s21  ;;  %p892_p9 = scmp.lt.u32.totalorder %s888_s21, %s1114_s0 }
  0x19   :  { %p894_p10 = pnand %p892_p9, %p889_p8 }
  0x1b   :  { %897 = shalt.err (!%p894_p10)
}
  0x1c   :  { %s898_s1 = scalar_lea.vmem %s23_s16, 32  ;;  %p903_p12 = scmp.lt.s32.totalorder %s23_s16, %s23_s16 }
  0x1d   :  { %p899_p11 = scmp.ne.s32.totalorder %s23_s16, %s898_s1  ;;  %p904_p13 = scmp.lt.s32.totalorder %s898_s1, %s898_s1 }
  0x1f   :  { %p905_p0 = por %p904_p13, %p903_p12 }
  0x21   :  { %p906_p1 = pnand %p905_p0, %p899_p11 }
  0x23   :  { %909 = shalt.err (!%p906_p1)
}
  0x24   :  { %25 = dma.hbm_to_vmem [thread:$0]  %s1114_s0, 32, %s23_s16, [#allocation3]  }
  0x25   :  { %s910_s30 = scalar_lea.hbm %s1117_s3, 8192 }
  0x26   :  { %p911_p2 = scmp.ne.s32.totalorder %s1117_s3, %s910_s30  ;;  %p914_p3 = scmp.lt.u32.totalorder %s910_s30, %s1117_s3 }
  0x28   :  { %p916_p4 = pnand %p914_p3, %p911_p2 }
  0x2a   :  { %919 = shalt.err (!%p916_p4)
}
  0x2b   :  { %s920_s12 = scalar_lea.vmem %s46_s18, 8192  ;;  %p925_p6 = scmp.lt.s32.totalorder %s46_s18, %s46_s18 }
  0x2c   :  { %p921_p5 = scmp.ne.s32.totalorder %s46_s18, %s920_s12  ;;  %p926_p7 = scmp.lt.s32.totalorder %s920_s12, %s920_s12 }
  0x2e   :  { %p927_p8 = por %p926_p7, %p925_p6 }
  0x30   :  { %p928_p9 = pnand %p927_p8, %p921_p5 }
  0x32   :  { %931 = shalt.err (!%p928_p9)
}
  0x33   :  { %s989_s0 = smov 128   ;;  %s990_s13 = smov 8  }
  0x34   :  { %51 = dma.hbm_to_vmem [thread:$0]  %s1117_s3, 8192, %s46_s18, [#allocation6], %s989_s0, %s989_s0, %s990_s13  }
  0x35   :  { %s991_s16 = smov [#allocation8]   ;;  %s932_s21 = scalar_lea.hbm %s1119_s5, 2048 }
  0x36   :  { %s59_s17 = sshll.u32 %s991_s16, 4  ;;  %p933_p10 = scmp.ne.s32.totalorder %s1119_s5, %s932_s21  ;;  %s60_s17 = int_to_ptr.vmem [resolvable:$true] %s59_s17 }
  0x37   :  { %p936_p11 = scmp.lt.u32.totalorder %s932_s21, %s1119_s5 }
  0x39   :  { %p938_p12 = pnand %p936_p11, %p933_p10 }
  0x3b   :  { %941 = shalt.err (!%p938_p12)
}
  0x3c   :  { %s942_s1 = scalar_lea.vmem %s60_s17, 2048  ;;  %p947_p0 = scmp.lt.s32.totalorder %s60_s17, %s60_s17 }
  0x3d   :  { %p943_p13 = scmp.ne.s32.totalorder %s60_s17, %s942_s1  ;;  %p948_p1 = scmp.lt.s32.totalorder %s942_s1, %s942_s1 }
  0x3f   :  { %p949_p2 = por %p948_p1, %p947_p0 }
  0x41   :  { %p950_p3 = pnand %p949_p2, %p943_p13 }
  0x43   :  { %953 = shalt.err (!%p950_p3)
}
  0x44   :  { %65 = dma.hbm_to_vmem [thread:$0]  %s1119_s5, 2048, %s60_s17, [#allocation9], %s989_s0, %s989_s0, %s990_s13  }
  0x45   :  { %976 = dma.done.wait [#allocation3], 32  }
  0x46   :  { %977 = vsyncadd [#allocation3], 4294967264 }
  0x47   :  { %978 = dma.done.wait [#allocation6], 12288  }
  0x48   :  { %979 = vsyncadd [#allocation6], 4294955008 }
  0x49   :  { %980 = dma.done.wait [#allocation9], 2048  }
  0x4a   :  { %981 = vsyncadd [#allocation9], 4294965248  ;;  %v992_v0 = vmov 0.0   ;;  %v82_v1 = vld [vmem:[#allocation5 + $0x8] sm:$0xff]  ;;  %v81_v3 = vld [vmem:[#allocation5] sm:$0xff]  ;;  %vm135_vm0 = vcmask 523264  }
  0x4b   :  { %203 = vmatprep.mubr.f32.mxu1 %v992_v0  ;;  %v86_v2 = vld [vmem:[#allocation5 + $0x28] sm:$0xff]  ;;  %v85_v5 = vld [vmem:[#allocation5 + $0x20] sm:$0xff]  ;;  %v84_v24 = vld [vmem:[#allocation5 + $0x18] sm:$0xff]  ;;  %vm994_vm1 = vmmov 0   ;;  %s995_s30 = smov [#allocation10]  }
  0x4c   :  { %v734_v4 = vpack.c.bf16 %v86_v2, %v82_v1  ;;  %v90_v6 = vld [vmem:[#allocation5 + $0x48] sm:$0xff]  ;;  %v736_v8 = vpack.c.bf16 %v85_v5, %v81_v3  ;;  %v89_v10 = vld [vmem:[#allocation5 + $0x40] sm:$0xff]  ;;  %v88_v25 = vld [vmem:[#allocation5 + $0x38] sm:$0xff]  ;;  %s597_s8 = sshll.u32 %s995_s30, 4  ;;  %s598_s8 = int_to_ptr.vmem [resolvable:$true] %s597_s8 }
  0x4d   :  { %v94_v7 = vld [vmem:[#allocation5 + $0x68] sm:$0xff]  ;;  %v93_v11 = vld [vmem:[#allocation5 + $0x60] sm:$0xff]  ;;  %v83_v26 = vld [vmem:[#allocation5 + $0x10] sm:$0xff]  ;;  %v750_v36 = vpack.c.bf16 %v88_v25, %v84_v24  ;;  %s954_s9 = scalar_lea.vmem %s598_s8, 32  ;;  %p959_p5 = scmp.lt.s32.totalorder %s598_s8, %s598_s8 }
  0x4e   :  { %v738_v9 = vpack.c.bf16 %v94_v7, %v90_v6  ;;  %v98_v12 = vld [vmem:[#allocation5 + $0x88] sm:$0xff]  ;;  %735 = vmatprep.subr.bf16.mxu1 %v734_v4  ;;  %v740_v14 = vpack.c.bf16 %v93_v11, %v89_v10  ;;  %v97_v16 = vld [vmem:[#allocation5 + $0x80] sm:$0xff]  ;;  %v87_v27 = vld [vmem:[#allocation5 + $0x30] sm:$0xff]  ;;  %p955_p4 = scmp.ne.s32.totalorder %s598_s8, %s954_s9  ;;  %p960_p6 = scmp.lt.s32.totalorder %s954_s9, %s954_s9 }
  0x4f   :  { %v102_v13 = vld [vmem:[#allocation5 + $0xa8] sm:$0xff]  ;;  %737 = vmatpush1.bf16.msra.mxu1 %v736_v8  ;;  %v101_v17 = vld [vmem:[#allocation5 + $0xa0] sm:$0xff]  ;;  %v303_v34 = vld [vmem:[#allocation7 + $0x90] sm:$0xff]  ;;  %v752_v47 = vpack.c.bf16 %v87_v27, %v83_v26 }
  0x50   :  { %739 = vmatprep.subr.bf16.mxu1 %v738_v9  ;;  %v742_v15 = vpack.c.bf16 %v102_v13, %v98_v12  ;;  %v106_v18 = vld [vmem:[#allocation5 + $0xc8] sm:$0xff]  ;;  %v744_v20 = vpack.c.bf16 %v101_v17, %v97_v16  ;;  %v105_v22 = vld [vmem:[#allocation5 + $0xc0] sm:$0xff]  ;;  %v304_v35 = vld [vmem:[#allocation7 + $0x98] sm:$0xff]  ;;  %p961_p7 = por %p960_p6, %p959_p5 }
  0x51   :  { %v110_v19 = vld [vmem:[#allocation5 + $0xe8] sm:$0xff]  ;;  %v109_v23 = vld [vmem:[#allocation5 + $0xe0] sm:$0xff]  ;;  %v92_v37 = vld [vmem:[#allocation5 + $0x58] sm:$0xff]  ;;  %v770_v39 = vpack.c.bf16 %v304_v35, %v303_v34 }
  0x52   :  { %v746_v21 = vpack.c.bf16 %v110_v19, %v106_v18  ;;  %v301_v28 = vld [vmem:[#allocation7 + $0x80] sm:$0xff]  ;;  %v302_v29 = vld [vmem:[#allocation7 + $0x88] sm:$0xff]  ;;  %v748_v31 = vpack.c.bf16 %v109_v23, %v105_v22  ;;  %v287_v40 = vld [vmem:[#allocation7 + $0x10] sm:$0xff]  ;;  %p962_p8 = pnand %p961_p7, %p955_p4 }
  0x53   :  { %741 = vmatpush1.bf16.msra.mxu1 %v740_v14  ;;  %v285_v30 = vld [vmem:[#allocation7] sm:$0xff]  ;;  %v766_v32 = vpack.c.bf16 %v302_v29, %v301_v28  ;;  %v286_v33 = vld [vmem:[#allocation7 + $0x8] sm:$0xff]  ;;  %v288_v41 = vld [vmem:[#allocation7 + $0x18] sm:$0xff] }
  0x54   :  { %743 = vmatprep.subr.bf16.mxu1 %v742_v15  ;;  %v768_v38 = vpack.c.bf16 %v286_v33, %v285_v30  ;;  %v96_v42 = vld [vmem:[#allocation5 + $0x78] sm:$0xff]  ;;  %v305_v43 = vld [vmem:[#allocation7 + $0xa0] sm:$0xff]  ;;  %v306_v44 = vld [vmem:[#allocation7 + $0xa8] sm:$0xff]  ;;  %v772_v46 = vpack.c.bf16 %v288_v41, %v287_v40 }
  0x55   :  { %767 = vmatprep.subr.bf16.mxu0 %v766_v32  ;;  %v1085_v45 = vld [vmem:[#allocation2] sm:$0x3]  ;;  %v91_v48 = vld [vmem:[#allocation5 + $0x50] sm:$0xff]  ;;  %v289_v49 = vld [vmem:[#allocation7 + $0x20] sm:$0xff]  ;;  %v754_v51 = vpack.c.bf16 %v96_v42, %v92_v37  ;;  %v774_v53 = vpack.c.bf16 %v306_v44, %v305_v43 }
  0x56   :  { %769 = vmatpush3.bf16.msra.mxu0 %v768_v38  ;;  %v290_v50 = vld [vmem:[#allocation7 + $0x28] sm:$0xff]  ;;  %v95_v52 = vld [vmem:[#allocation5 + $0x70] sm:$0xff]  ;;  %v308_v55 = vld [vmem:[#allocation7 + $0xb8] sm:$0xff] }
  0x57   :  { %745 = vmatpush1.bf16.msra.mxu1 %v744_v20  ;;  %771 = vmatprep.subr.bf16.mxu0 %v770_v39  ;;  %v307_v54 = vld [vmem:[#allocation7 + $0xb0] sm:$0xff]  ;;  %v100_v56 = vld [vmem:[#allocation5 + $0x98] sm:$0xff]  ;;  %v776_v58 = vpack.c.bf16 %v290_v50, %v289_v49  ;;  %v756_v59 = vpack.c.bf16 %v95_v52, %v91_v48  ;;  %v309_v3 = vld [vmem:[#allocation7 + $0xc0] sm:$0xff] }
  0x58   :  { %747 = vmatprep.subr.bf16.mxu1 %v746_v21  ;;  %v104_v57 = vld [vmem:[#allocation5 + $0xb8] sm:$0xff]  ;;  %v99_v60 = vld [vmem:[#allocation5 + $0x90] sm:$0xff]  ;;  %v778_v61 = vpack.c.bf16 %v308_v55, %v307_v54  ;;  %v310_v4 = vld [vmem:[#allocation7 + $0xc8] sm:$0xff] }
  0x59   :  { %v291_v62 = vld [vmem:[#allocation7 + $0x30] sm:$0xff]  ;;  %v292_v63 = vld [vmem:[#allocation7 + $0x38] sm:$0xff]  ;;  %v758_v1 = vpack.c.bf16 %v104_v57, %v100_v56  ;;  %v782_v10 = vpack.c.bf16 %v310_v4, %v309_v3  ;;  %v293_v11 = vld [vmem:[#allocation7 + $0x40] sm:$0xff] }
  0x5a   :  { %773 = vmatpush3.bf16.msra.mxu0 %v772_v46  ;;  %v103_v2 = vld [vmem:[#allocation5 + $0xb0] sm:$0xff]  ;;  %v108_v5 = vld [vmem:[#allocation5 + $0xd8] sm:$0xff]  ;;  %v780_v7 = vpack.c.bf16 %v292_v63, %v291_v62  ;;  %v294_v12 = vld [vmem:[#allocation7 + $0x48] sm:$0xff] }
  0x5b   :  { %749 = vmatpush1.bf16.msra.mxu1 %v748_v31  ;;  %775 = vmatprep.subr.bf16.mxu0 %v774_v53  ;;  %v112_v6 = vld [vmem:[#allocation5 + $0xf8] sm:$0xff]  ;;  %v760_v8 = vpack.c.bf16 %v103_v2, %v99_v60  ;;  %v107_v9 = vld [vmem:[#allocation5 + $0xd0] sm:$0xff]  ;;  %v333_v17 = vld [vmem:[#allocation7 + $0x180] sm:$0xff]  ;;  %v784_v19 = vpack.c.bf16 %v294_v12, %v293_v11 }
  0x5c   :  { %751 = vmatprep.subr.bf16.mxu1 %v750_v36  ;;  %v762_v13 = vpack.c.bf16 %v112_v6, %v108_v5  ;;  %v111_v14 = vld [vmem:[#allocation5 + $0xf0] sm:$0xff]  ;;  %v312_v16 = vld [vmem:[#allocation7 + $0xd8] sm:$0xff]  ;;  %v334_v18 = vld [vmem:[#allocation7 + $0x188] sm:$0xff] }
  0x5d   :  { %v311_v15 = vld [vmem:[#allocation7 + $0xd0] sm:$0xff]  ;;  %v764_v20 = vpack.c.bf16 %v111_v14, %v107_v9  ;;  %v317_v21 = vld [vmem:[#allocation7 + $0x100] sm:$0xff]  ;;  %v296_v24 = vld [vmem:[#allocation7 + $0x58] sm:$0xff]  ;;  %v798_v25 = vpack.c.bf16 %v334_v18, %v333_v17 }
  0x5e   :  { %608 = vmatmul.mubr.msk.f32.vlgmr.msra.gmra.mrb[0].mxu1 %vm135_vm0, %v1085_v45  ;;  %777 = vmatpush3.bf16.msra.mxu0 %v776_v58  ;;  %v786_v22 = vpack.c.bf16 %v312_v16, %v311_v15  ;;  %v295_v23 = vld [vmem:[#allocation7 + $0x50] sm:$0xff]  ;;  %v318_v26 = vld [vmem:[#allocation7 + $0x108] sm:$0xff]  ;;  %v313_v27 = vld [vmem:[#allocation7 + $0xe0] sm:$0xff] }
  0x5f   :  { %753 = vmatpush1.bf16.msra.mxu1 %v752_v47  ;;  %274 = vmatprep.mubr.f32.mxu1 %v992_v0  ;;  %v314_v28 = vld [vmem:[#allocation7 + $0xe8] sm:$0xff]  ;;  %v335_v29 = vld [vmem:[#allocation7 + $0x190] sm:$0xff]  ;;  %v336_v30 = vld [vmem:[#allocation7 + $0x198] sm:$0xff]  ;;  %v788_v31 = vpack.c.bf16 %v296_v24, %v295_v23  ;;  %v800_v32 = vpack.c.bf16 %v318_v26, %v317_v21  ;;  %v115_v21 = vlaneseq }
  0x60   :  { %755 = vmatprep.subr.bf16.mxu1 %v754_v51  ;;  %779 = vmatprep.subr.bf16.mxu0 %v778_v61  ;;  %v790_v33 = vpack.c.bf16 %v314_v28, %v313_v27  ;;  %v802_v34 = vpack.c.bf16 %v336_v30, %v335_v29  ;;  %v319_v35 = vld [vmem:[#allocation7 + $0x110] sm:$0xff]  ;;  %v320_v36 = vld [vmem:[#allocation7 + $0x118] sm:$0xff]  ;;  %v337_v37 = vld [vmem:[#allocation7 + $0x1a0] sm:$0xff] }
  0x61   :  { %v338_v38 = vld [vmem:[#allocation7 + $0x1a8] sm:$0xff]  ;;  %v804_v39 = vpack.c.bf16 %v320_v36, %v319_v35  ;;  %v297_v41 = vld [vmem:[#allocation7 + $0x60] sm:$0xff]  ;;  %v315_v48 = vld [vmem:[#allocation7 + $0xf0] sm:$0xff] }
  0x62   :  { %781 = vmatpush3.bf16.msra.mxu0 %v780_v7  ;;  %v806_v40 = vpack.c.bf16 %v338_v38, %v337_v37  ;;  %v298_v42 = vld [vmem:[#allocation7 + $0x68] sm:$0xff]  ;;  %v321_v43 = vld [vmem:[#allocation7 + $0x120] sm:$0xff]  ;;  %v316_v49 = vld [vmem:[#allocation7 + $0xf8] sm:$0xff] }
  0x63   :  { %757 = vmatpush1.bf16.msra.mxu1 %v756_v59  ;;  %783 = vmatprep.subr.bf16.mxu0 %v782_v10  ;;  %v792_v44 = vpack.c.bf16 %v298_v42, %v297_v41  ;;  %v322_v46 = vld [vmem:[#allocation7 + $0x128] sm:$0xff]  ;;  %v339_v50 = vld [vmem:[#allocation7 + $0x1b0] sm:$0xff]  ;;  %v340_v51 = vld [vmem:[#allocation7 + $0x1b8] sm:$0xff] }
  0x64   :  { %759 = vmatprep.subr.bf16.mxu1 %v758_v1  ;;  %v808_v47 = vpack.c.bf16 %v322_v46, %v321_v43  ;;  %v299_v52 = vld [vmem:[#allocation7 + $0x70] sm:$0xff]  ;;  %v300_v53 = vld [vmem:[#allocation7 + $0x78] sm:$0xff]  ;;  %v810_v54 = vpack.c.bf16 %v340_v51, %v339_v50  ;;  %v341_v59 = vld [vmem:[#allocation7 + $0x1c0] sm:$0xff] }
  0x65   :  { %v796_v55 = vpack.c.bf16 %v300_v53, %v299_v52  ;;  %v323_v56 = vld [vmem:[#allocation7 + $0x130] sm:$0xff]  ;;  %v324_v57 = vld [vmem:[#allocation7 + $0x138] sm:$0xff]  ;;  %v342_v60 = vld [vmem:[#allocation7 + $0x1c8] sm:$0xff] }
  0x66   :  { %785 = vmatpush3.bf16.msra.mxu0 %v784_v19  ;;  %v812_v58 = vpack.c.bf16 %v324_v57, %v323_v56  ;;  %v814_v61 = vpack.c.bf16 %v342_v60, %v341_v59  ;;  %v325_v62 = vld [vmem:[#allocation7 + $0x140] sm:$0xff]  ;;  %v326_v63 = vld [vmem:[#allocation7 + $0x148] sm:$0xff]  ;;  %v343_v2 = vld [vmem:[#allocation7 + $0x1d0] sm:$0xff] }
  0x67   :  { %761 = vmatpush1.bf16.msra.mxu1 %v760_v8  ;;  %787 = vmatprep.subr.bf16.mxu0 %v786_v22  ;;  %v816_v1 = vpack.c.bf16 %v326_v63, %v325_v62  ;;  %v344_v3 = vld [vmem:[#allocation7 + $0x1d8] sm:$0xff]  ;;  %v327_v4 = vld [vmem:[#allocation7 + $0x150] sm:$0xff]  ;;  %v345_v7 = vld [vmem:[#allocation7 + $0x1e0] sm:$0xff]  ;;  %v116_v22 = vshrl.u32 %v115_v21, 7 }
  0x68   :  { %763 = vmatprep.subr.bf16.mxu1 %v762_v13  ;;  %v818_v5 = vpack.c.bf16 %v344_v3, %v343_v2  ;;  %v328_v6 = vld [vmem:[#allocation7 + $0x158] sm:$0xff]  ;;  %v346_v8 = vld [vmem:[#allocation7 + $0x1e8] sm:$0xff]  ;;  %v329_v11 = vld [vmem:[#allocation7 + $0x160] sm:$0xff] }
  0x69   :  { %v820_v9 = vpack.c.bf16 %v328_v6, %v327_v4  ;;  %v822_v10 = vpack.c.bf16 %v346_v8, %v345_v7  ;;  %v330_v12 = vld [vmem:[#allocation7 + $0x168] sm:$0xff]  ;;  %v347_v14 = vld [vmem:[#allocation7 + $0x1f0] sm:$0xff]  ;;  %v348_v15 = vld [vmem:[#allocation7 + $0x1f8] sm:$0xff]  ;;  %v117_v23 = vsub.s32 0, %v116_v22  ;;  %v129_v41 = vsub.s32 3, %v116_v22 }
  0x6a   :  { %789 = vmatpush3.bf16.msra.mxu0 %v788_v31  ;;  %v824_v13 = vpack.c.bf16 %v330_v12, %v329_v11  ;;  %v826_v16 = vpack.c.bf16 %v348_v15, %v347_v14  ;;  %v331_v17 = vld [vmem:[#allocation7 + $0x170] sm:$0xff]  ;;  %v332_v18 = vld [vmem:[#allocation7 + $0x178] sm:$0xff]  ;;  %v497_v31 = vld [vmem:[#allocation8] sm:$0xff] }
  0x6b   :  { %765 = vmatpush1.bf16.msra.mxu1 %v764_v20  ;;  %791 = vmatprep.subr.bf16.mxu0 %v790_v33  ;;  %v828_v19 = vpack.c.bf16 %v332_v18, %v331_v17  ;;  %v993_v20 = vmov 0.0|0.0   ;;  %v113_v24 = vld [vmem:[%s1116_s2] sm:$0xf]  ;;  %v502_v51 = vld [vmem:[#allocation8 + $0x28] sm:$0xff]  ;;  %v505_v56 = vld [vmem:[#allocation8 + $0x40] sm:$0xff] }
  0x6c   :  { %799 = vmatprep.subr.bf16.mxu1 %v798_v25  ;;  %v121_v25 = vsub.s32 1, %v116_v22  ;;  %v118_v26 = vrot.slane %v113_v24, %v117_v23  ;;  %v499_v37 = vld [vmem:[#allocation8 + $0x10] sm:$0xff]  ;;  %v500_v38 = vld [vmem:[#allocation8 + $0x18] sm:$0xff]  ;;  %v130_v43 = vrot.slane %v113_v24, %v129_v41  ;;  %v506_v57 = vld [vmem:[#allocation8 + $0x48] sm:$0xff] }
  0x6d   :  { %v503_v53 = vld [vmem:[#allocation8 + $0x30] sm:$0xff]  ;;  %v508_v60 = vld [vmem:[#allocation8 + $0x58] sm:$0xff]  ;;  %v509_v62 = vld [vmem:[#allocation8 + $0x60] sm:$0xff] }
  0x6e   :  { %609 = vmatmul.mubr.msk.f32.vlgmr.msra.gmra.mrb[2].mxu1 %vm135_vm0, %v1085_v45  ;;  %793 = vmatpush3.bf16.msra.mxu0 %v792_v44  ;;  %v794_v45 = vpack.c.bf16 %v316_v49, %v315_v48  ;;  %v122_v27 = vrot.slane %v113_v24, %v121_v25  ;;  %v507_v59 = vld [vmem:[#allocation8 + $0x50] sm:$0xff]  ;;  %v510_v63 = vld [vmem:[#allocation8 + $0x68] sm:$0xff]  ;;  %v512_v3 = vld [vmem:[#allocation8 + $0x78] sm:$0xff] }
  0x6f   :  { %801 = vmatpush3.bf16.msra.mxu1 %v800_v32  ;;  %v498_v32 = vld [vmem:[#allocation8 + $0x8] sm:$0xff]  ;;  %v511_v2 = vld [vmem:[#allocation8 + $0x70] sm:$0xff] }
  0x70   :  { %803 = vmatprep.subr.bf16.mxu1 %v802_v34  ;;  %795 = vmatprep.subr.bf16.mxu0 %v794_v45  ;;  %v831_v36 = vpack.c.bf16 %v498_v32, %v497_v31  ;;  %v501_v45 = vld [vmem:[#allocation8 + $0x20] sm:$0xff]  ;;  %v852_v4 = vpack.c.bf16 %v512_v3, %v511_v2  ;;  %v610_v8 = vld [vmem:[%s1118_s4] ss:$0 sm:$0xff] }
  0x71   :  { %v837_v52 = vpack.c.bf16 %v502_v51, %v501_v45  ;;  %v611_v15 = vld [vmem:[%s1120_s6] ss:$0 sm:$0xff] }
  0x72   :  { %797 = vmatpush3.bf16.msra.mxu0 %v796_v55 }
  0x73   :  { %805 = vmatpush3.bf16.msra.mxu1 %v804_v39  ;;  %830 = vmatprep.subr.bf16.mxu0 %v993_v20  ;;  %v834_v39 = vpack.c.bf16 %v500_v38, %v499_v37 }
  0x74   :  { %807 = vmatprep.subr.bf16.mxu1 %v806_v40  ;;  %v125_v40 = vsub.s32 2, %v116_v22 }
  0x76   :  { %v126_v42 = vrot.slane %v113_v24, %v125_v40 }
  0x77   :  { %809 = vmatpush3.bf16.msra.mxu1 %v808_v47 }
  0x78   :  { %811 = vmatprep.subr.bf16.mxu1 %v810_v54  ;;  %v504_v54 = vld [vmem:[#allocation8 + $0x38] sm:$0xff] }
  0x79   :  { %v840_v55 = vpack.c.bf16 %v504_v54, %v503_v53 }
  0x7b   :  { %813 = vmatpush3.bf16.msra.mxu1 %v812_v58  ;;  %v843_v58 = vpack.c.bf16 %v506_v57, %v505_v56 }
  0x7c   :  { %815 = vmatprep.subr.bf16.mxu1 %v814_v61  ;;  %v846_v61 = vpack.c.bf16 %v508_v60, %v507_v59 }
  0x7f   :  { %817 = vmatpush3.bf16.msra.mxu1 %v816_v1  ;;  %v849_v1 = vpack.c.bf16 %v510_v63, %v509_v62 }
  0x80   :  { %819 = vmatprep.subr.bf16.mxu1 %v818_v5 }
  0x83   :  { %821 = vmatpush3.bf16.msra.mxu1 %v820_v9 }
  0x84   :  { %823 = vmatprep.subr.bf16.mxu1 %v822_v10 }
  0x87   :  { %825 = vmatpush3.bf16.msra.mxu1 %v824_v13 }
  0x88   :  { %827 = vmatprep.subr.bf16.mxu1 %v826_v16 }
  0x8b   :  { %829 = vmatpush3.bf16.msra.mxu1 %v828_v19 }
 0x131   :  { %v205_v28 = vpop.f32.mrb[0].mxu1 }
 0x132   :  { %v206_v29 = vadd.f32 %v205_v28, %v118_v26  ;;  %v207_v30 = vpop.f32.mrb[1].mxu1 }
 0x133   :  { %v208_v33 = vadd.f32 %v207_v30, %v122_v27 }
 0x134   :  { %v281_v34 = vmax.f32 %v206_v29, 0.0 }
 0x135   :  { %v282_v35 = vmax.f32 %v208_v33, 0.0 }
 0x137   :  { %420 = vmatprep.mubr.f32.mxu0 %v282_v35 }
 0x138   :  { %421 = vmatmul.mubr.f32.vlgmr.msra.gmra.mrb[0].mxu0 %v281_v34 }
 0x139   :  { %832 = vmatpush3.bf16.msra.mxu0 %v831_v36  ;;  %731 = vmatprep.mubr.msk.f32.mxu0 %vm994_vm1, %v992_v0 }
 0x13a   :  { %833 = vmatprep.subr.bf16.mxu0 %v993_v20 }
 0x13d   :  { %835 = vmatpush3.bf16.msra.mxu0 %v834_v39 }
 0x13e   :  { %836 = vmatprep.subr.bf16.mxu0 %v993_v20 }
 0x141   :  { %v276_v44 = vpop.f32.mrb[2].mxu1  ;;  %838 = vmatpush3.bf16.msra.mxu0 %v837_v52 }
 0x142   :  { %v277_v46 = vadd.f32 %v276_v44, %v126_v42  ;;  %v278_v47 = vpop.f32.mrb[3].mxu1  ;;  %839 = vmatprep.subr.bf16.mxu0 %v993_v20 }
 0x143   :  { %v279_v48 = vadd.f32 %v278_v47, %v130_v43 }
 0x144   :  { %v283_v50 = vmax.f32 %v277_v46, 0.0 }
 0x145   :  { %v284_v49 = vmax.f32 %v279_v48, 0.0  ;;  %841 = vmatpush3.bf16.msra.mxu0 %v840_v55 }
 0x146   :  { %842 = vmatprep.subr.bf16.mxu0 %v993_v20 }
 0x147   :  { %490 = vmatprep.mubr.f32.mxu1 %v284_v49 }
 0x148   :  { %491 = vmatmul.mubr.f32.vlgmr.msra.gmra.mrb[4].mxu1 %v283_v50 }
 0x149   :  { %844 = vmatpush3.bf16.msra.mxu0 %v843_v58 }
 0x14a   :  { %845 = vmatprep.subr.bf16.mxu0 %v993_v20 }
 0x14d   :  { %847 = vmatpush3.bf16.msra.mxu0 %v846_v61 }
 0x14e   :  { %848 = vmatprep.subr.bf16.mxu0 %v993_v20 }
 0x151   :  { %850 = vmatpush3.bf16.msra.mxu0 %v849_v1 }
 0x152   :  { %851 = vmatprep.subr.bf16.mxu0 %v993_v20 }
 0x155   :  { %853 = vmatpush3.bf16.msra.mxu0 %v852_v4 }
 0x20b   :  { %v644_v5 = vpop.f32.mrb[0].mxu0 }
 0x20c   :  { %v645_v6 = vpop.f32.mrb[1].mxu0 }
 0x20d   :  { %v646_v7 = vadd.f32 %v645_v6, %v644_v5 }
 0x20f   :  { %v423_v11 = vadd.f32 %v646_v7, %v610_v8 }
 0x21b   :  { %v679_v9 = vpop.f32.mrb[4].mxu1 }
 0x21c   :  { %v680_v10 = vpop.f32.mrb[5].mxu1 }
 0x21d   :  { %v681_v12 = vadd.f32 %v680_v10, %v679_v9 }
 0x21f   :  { %v493_v13 = vadd.f32 %v681_v12, %v423_v11 }
 0x221   :  { %v496_v14 = vmax.f32 %v493_v13, 0.0 }
 0x223   :  { %732 = vmatmul.mubr.f32.vlgmr.msra.gmra.mrb[2].mxu0 %v496_v14 }
 0x2f6   :  { %v586_v0 = vpop.f32.mrb[2].mxu0 }
 0x2f7   :  { %v587_v16 = vadd.f32 %v611_v15, %v586_v0  ;;  %v733_v17 = vpop.f32.mrb[3].mxu0 }
 0x2f9   :  { %590 = vst [vmem:[#allocation10] sm:$0x3] %v587_v16 }
 0x2fa   :  { %965 = shalt.err (!%p962_p8)
}
 0x2fb   :  { %s966_s11 = scalar_lea.hbm %s1121_s7, 32 }
 0x2fc   :  { %p967_p9 = scmp.ne.s32.totalorder %s1121_s7, %s966_s11  ;;  %p970_p10 = scmp.lt.u32.totalorder %s966_s11, %s1121_s7 }
 0x2fe   :  { %p972_p11 = pnand %p970_p10, %p967_p9 }
 0x300   :  { %975 = shalt.err (!%p972_p11)
}
 0x301   :  { %600 = dma.vmem_to_hbm [thread:$0]  %s598_s8, 32, %s1121_s7, [#allocation4]  }
 0x302   :  { %982 = dma.done.wait [#allocation4], 32  }
 0x303   :  { %983 = vsyncadd [#allocation4], 4294967264 }
 0x304   :  { %604 = vsyncpa [#allocation3], 1 }
 0x305   :  { %605 = vsyncpa [#allocation6], 1 }
 0x306   :  { %606 = vsyncpa [#allocation9], 1 }
 0x307   :  { %607 = vsyncpa [#allocation4], 1 }

</bundles_post_ra>
